<compile_context>
chip_gen: v7x
topology: tpu7x:2x2x1
jax: 0.10.0
libtpu: 0.0.40
codegen_flags: <defaults>
</compile_context>

<pallas_src>
import jax
import jax.numpy as jnp
from jax.experimental import pallas as pl
from jax.experimental.pallas import tpu as pltpu


# ----------------------------------------------------------------------------
# True-to-spec Identity: zero kernels, zero HBM traffic.
# ----------------------------------------------------------------------------
def identity_forward(*inputs):
    """Pallas-free equivalent of Identity.forward(*input): the input tuple."""
    return inputs


# ----------------------------------------------------------------------------
# Optional Pallas pass-through (for demonstrating / benchmarking the pattern):
# one HBM->HBM async copy per tensor.  No grid, no VMEM staging buffers.
# ----------------------------------------------------------------------------
def _hbm_copy_kernel(x_hbm, o_hbm, sem):
    # Single whole-array DMA: HBM input ref -> HBM output ref.
    cp = pltpu.make_async_copy(x_hbm, o_hbm, sem)
    cp.start()
    cp.wait()


def _identity_copy_one(x: jax.Array) -> jax.Array:
    """Bit-exact copy of `x` via a single HBM->HBM DMA inside Pallas."""
    if x.size == 0:
        return x

    nbytes = x.size * jnp.dtype(x.dtype).itemsize
    return pl.pallas_call(
        _hbm_copy_kernel,
        out_shape=jax.ShapeDtypeStruct(x.shape, x.dtype),
        in_specs=[pl.BlockSpec(memory_space=pl.ANY)],
        out_specs=pl.BlockSpec(memory_space=pl.ANY),
        scratch_shapes=[pltpu.SemaphoreType.DMA(())],
        cost_estimate=pl.CostEstimate(
            flops=0, transcendentals=0, bytes_accessed=2 * nbytes
        ),
    )(x)


def identity_forward_pallas(*inputs):
    """Identity that materializes fresh output buffers via Pallas HBM->HBM DMA."""
    return tuple(_identity_copy_one(x) for x in inputs)


if __name__ == "__main__":
    key = jax.random.PRNGKey(0)
    k1, k2 = jax.random.split(key)

    # Small shapes consistent with a conv-style model input (NCHW) plus a
    # second tensor to exercise the *input tuple semantics.
    x = jax.random.normal(k1, (2, 4, 16, 16), dtype=jnp.float32)
    y = jax.random.normal(k2, (2, 32), dtype=jnp.float32)

    # Primary (optimal) path: no kernel, inputs returned untouched.
    out = identity_forward(x, y)
    assert isinstance(out, tuple) and len(out) == 2
    assert out[0] is x and out[1] is y

    # Demonstration Pallas path: single HBM->HBM DMA copy per tensor.
    out_p = identity_forward_pallas(x, y)
    out_p = jax.block_until_ready(out_p)

    assert isinstance(out_p, tuple) and len(out_p) == 2
    assert out_p[0].shape == x.shape and out_p[0].dtype == x.dtype
    assert out_p[1].shape == y.shape and out_p[1].dtype == y.dtype
    assert bool(jnp.all(out_p[0] == x)) and bool(jnp.all(out_p[1] == y))

    print("KERNEL_OK")
</pallas_src>

<mosaic_0001>
module attributes {stable_mosaic.version = 11 : i64} {
  func.func @_hbm_copy_kernel(%arg0: memref<2x4x16x16xf32, #tpu.memory_space<any>>, %arg1: memref<2x4x16x16xf32, #tpu.memory_space<any>>, %arg2: memref<!tpu.dma_semaphore, #tpu.memory_space<semaphore_mem>>) attributes {dimension_semantics = [], scalar_prefetch = 0 : i64, scratch_operands = 1 : i64, tpu.core_type = #tpu.core_type<tc>} {
    tpu.enqueue_dma source(%arg0 : memref<2x4x16x16xf32, #tpu.memory_space<any>>) target(%arg1 : memref<2x4x16x16xf32, #tpu.memory_space<any>>) target_semaphore(%arg2 : memref<!tpu.dma_semaphore, #tpu.memory_space<semaphore_mem>>)
    tpu.wait_dma2 semaphore(%arg2 : memref<!tpu.dma_semaphore, #tpu.memory_space<semaphore_mem>>) src(%arg0 : memref<2x4x16x16xf32, #tpu.memory_space<any>>) dst(%arg1 : memref<2x4x16x16xf32, #tpu.memory_space<any>>)
    return
  }
}

</mosaic_0001>

<bundles_post_ra>
// kernel: tpu_custom_call.1
= control target key start
LH: loop header
LB: loop body
LE: loop exit
PB: predicated region body
PF: predicated region fallthrough
CT: control target
= control target key end

     0   :  { %s36_s6 = smov [#allocation2]   ;;  %s37_s7 = smov [#allocation3]   ;;  %s55_s0 = inlined_call_operand.hbm [shape: f32[2,4,16,16], index: 0, kind: input, shape index: {}]   ;;  %s56_s1 = inlined_call_operand.hbm [shape: f32[2,4,16,16], index: 1, kind: output, shape index: {}]  }
   0x1   :  { %s38_s8 = smov 0  }
   0x2   :  { %18 = dma.general %s55_s0, 2048, %s56_s1, %s36_s6, %s37_s7, [#allocation4], %s38_s8, 0  }
   0x3   :  { %34 = dma.done.wait [#allocation2], 2048 }
   0x4   :  { %35 = vsyncadd [#allocation2], 4294965248 }
   0x5   :  { %24 = vsyncmov [#allocation2] }
   0x8   :  { %s25_s13 = vpop.sfrf %24 }
   0x9   :  { %p30_p0 = scmp.ne.s32.totalorder %s25_s13, 0 }
   0xb   :  { %29 = shalt.err (%p30_p0)  }

</bundles_post_ra>
